<compile_context>
chip_gen: v5e
topology: v5e:2x2
jax: 0.10.0
libtpu: 0.0.40
codegen_flags: <defaults>
</compile_context>

<pallas_src>
import functools

import jax
import jax.numpy as jnp
import numpy as np
from jax.experimental import pallas as pl
from jax.experimental.pallas import tpu as pltpu


_FUSED_VMEM_BUDGET = 40 * 1024 * 1024   # stay well under v7x's 64 MiB physical VMEM
_VMEM_LIMIT_CAP = 48 * 1024 * 1024


def _round_up(x: int, m: int) -> int:
    return ((x + m - 1) // m) * m


def _apply_activation(y, activation: str):
    if activation == "tanh":
        return jnp.tanh(y)                                   # EUP slot
    if activation == "relu":
        return jnp.maximum(y, 0.0)                           # VPU
    if activation == "softplus":
        # numerically stable softplus; exp/log go to the EUP slot
        return jnp.maximum(y, 0.0) + jnp.log(1.0 + jnp.exp(-jnp.abs(y)))
    if activation == "none":
        return y
    raise ValueError(f"unknown activation: {activation}")


# ----------------------------------------------------------------------------
# Fully fused encoder kernel: one batch tile, all weights VMEM-resident.
# ----------------------------------------------------------------------------
def _encoder_fused_kernel(*refs, n_hidden, hidden_act, compute_dtype):
    """Whole-encoder forward for one (tm, K0p) batch tile.

    refs = (x_ref,
            w1_ref, b1_ref, ..., w{n}_ref, b{n}_ref,     # hidden layers
            w_mu_ref, b_mu_ref, w_s_ref, b_s_ref,         # heads
            mu_ref, sigma2_ref)                           # outputs
    Weights are full-block VMEM residents; activations never leave VMEM.
    """
    x_ref = refs[0]
    h = x_ref[...]                                        # (tm, K0p) compute dtype
    idx = 1
    for _ in range(n_hidden):
        w_ref, b_ref = refs[idx], refs[idx + 1]
        idx += 2
        y = jnp.dot(h, w_ref[...], preferred_element_type=jnp.float32)  # MXU
        y = _apply_activation(y + b_ref[...], hidden_act)               # f32 epilogue
        h = y.astype(compute_dtype)                                     # back to MXU dtype
    w_mu_ref, b_mu_ref, w_s_ref, b_s_ref = refs[idx:idx + 4]
    mu_ref, sigma2_ref = refs[idx + 4], refs[idx + 5]
    mu = jnp.dot(h, w_mu_ref[...], preferred_element_type=jnp.float32) + b_mu_ref[...]
    s = jnp.dot(h, w_s_ref[...], preferred_element_type=jnp.float32) + b_s_ref[...]
    mu_ref[...] = mu.astype(mu_ref.dtype)
    sigma2_ref[...] = _apply_activation(s, "softplus").astype(sigma2_ref.dtype)


# ----------------------------------------------------------------------------
# Fallback: single fused Linear+activation, full-K-resident weight, grid (M, N).
# Only used if the whole network's weights do not fit the VMEM budget.
# ----------------------------------------------------------------------------
def _linear_full_k_kernel(x_ref, w_ref, b_ref, o_ref, *, activation):
    y = jnp.dot(x_ref[...], w_ref[...], preferred_element_type=jnp.float32)
    y = _apply_activation(y + b_ref[...], activation)
    o_ref[...] = y.astype(o_ref.dtype)


def _fused_linear_padded(xp, wp, bp, activation, *, out_dtype, tm):
    """activation(xp @ wp + bp) on already padded/cast operands; returns padded out."""
    Mp, Kp = xp.shape
    Kw, Np = wp.shape
    assert Kp == Kw and Mp % tm == 0
    tn = 256 if Np % 256 == 0 else 128
    grid = (Mp // tm, Np // tn)
    # TODO(synk): layers too large for a VMEM-resident (Kp, tn) weight block would
    # need a K grid axis + accumulator; not needed for IWAE-sized encoders.
    return pl.pallas_call(
        functools.partial(_linear_full_k_kernel, activation=activation),
        out_shape=jax.ShapeDtypeStruct((Mp, Np), out_dtype),
        grid_spec=pltpu.PrefetchScalarGridSpec(
            num_scalar_prefetch=0,
            grid=grid,
            in_specs=[
                pl.BlockSpec((tm, Kp), lambda i, j: (i, 0)),
                pl.BlockSpec((Kp, tn), lambda i, j: (0, j)),
                pl.BlockSpec((1, tn), lambda i, j: (0, j)),
            ],
            out_specs=pl.BlockSpec((tm, tn), lambda i, j: (i, j)),
        ),
        compiler_params=pltpu.CompilerParams(
            dimension_semantics=("parallel", "parallel"),
            vmem_limit_bytes=32 * 1024 * 1024,
        ),
    )(xp, wp, bp)


# ----------------------------------------------------------------------------
# Encoder module (forward pass only)
# ----------------------------------------------------------------------------
class Encoder:
    """JAX/Pallas port of the PyTorch IWAE Encoder (forward pass only)."""

    def __init__(self, in_features=28 * 28, hidden_features=500,
                 latent_features=2, nonlinearity="tanh", *,
                 key, compute_dtype=jnp.bfloat16, block_m=256):
        if nonlinearity not in ("tanh", "relu"):
            raise ValueError(f"Unknown activation function: {nonlinearity}")
        if isinstance(hidden_features, int):
            hidden_features = (hidden_features,)
        hidden_features = tuple(hidden_features)

        self.in_features = int(in_features)
        self.hidden_features = hidden_features
        self.latent_features = int(latent_features)
        self.nonlinearity = nonlinearity
        self.compute_dtype = compute_dtype
        self.block_m = int(block_m)

        def init_linear(k, fan_in, fan_out):
            # torch.nn.Linear default init: U(-1/sqrt(fan_in), 1/sqrt(fan_in)).
            # Weight stored pre-transposed as (in, out) so the kernel computes
            # y = x @ W + b  (== PyTorch x @ W.T + b).
            kw, kb = jax.random.split(k)
            bound = 1.0 / np.sqrt(fan_in)
            W = jax.random.uniform(kw, (fan_in, fan_out), jnp.float32, -bound, bound)
            b = jax.random.uniform(kb, (fan_out,), jnp.float32, -bound, bound)
            return W, b

        features = (self.in_features,) + hidden_features
        self.ref_hidden = []
        for i in range(len(features) - 1):
            key, sub = jax.random.split(key)
            self.ref_hidden.append(init_linear(sub, features[i], features[i + 1]))
        key, k_mu = jax.random.split(key)
        self.ref_mu = init_linear(k_mu, hidden_features[-1], self.latent_features)
        key, k_s = jax.random.split(key)
        self.ref_sigma = init_linear(k_s, hidden_features[-1], self.latent_features)

        # ---- one-time (hoisted) weight prep: pad to (128, 128) multiples and
        # cast weights to the MXU compute dtype; biases stay f32 as (1, Np). ----
        cd = compute_dtype

        def pad_wb(W, b):
            K, N = W.shape
            Kp, Np = _round_up(K, 128), _round_up(N, 128)
            Wp = jnp.pad(W, ((0, Kp - K), (0, Np - N))).astype(cd)
            bp = jnp.pad(b, (0, Np - N)).astype(jnp.float32).reshape(1, Np)
            return Wp, bp

        # Order: hidden layers..., mu head, sigma head (kernel arg order).
        self._padded_params = [pad_wb(W, b) for W, b in self.ref_hidden]
        self._padded_params.append(pad_wb(*self.ref_mu))
        self._padded_params.append(pad_wb(*self.ref_sigma))

        self._k0p = _round_up(self.in_features, 128)
        self._lp = _round_up(self.latent_features, 128)

        est = self._estimate_fused_vmem()
        self._use_fused = est <= _FUSED_VMEM_BUDGET
        self._vmem_limit = min(_VMEM_LIMIT_CAP, max(32 * 1024 * 1024, est + (8 << 20)))

    # -- VMEM footprint estimate for the fully fused kernel (worst-case tm) ----
    def _estimate_fused_vmem(self) -> int:
        w_bytes = sum(int(w.size) * w.dtype.itemsize + int(b.size) * b.dtype.itemsize
                      for w, b in self._padded_params)
        max_np = max(int(w.shape[1]) for w, _ in self._padded_params)
        tm = self.block_m
        x_bytes = tm * self._k0p * jnp.dtype(self.compute_dtype).itemsize
        out_bytes = 2 * tm * self._lp * 4
        work_bytes = 2 * tm * max_np * 4
        # inputs/outputs may be double-buffered by the pipeline.
        return 2 * (w_bytes + x_bytes + out_bytes) + work_bytes

    # -- forward ---------------------------------------------------------------
    def __call__(self, x):
        if x.ndim > 2:
            x = x.reshape(-1, x.shape[-1] * x.shape[-2])
        M, K = x.shape
        assert K == self.in_features

        sub = 16 if self.compute_dtype == jnp.bfloat16 else 8
        tm = min(self.block_m, _round_up(M, sub))
        Mp = _round_up(M, tm)

        xp = jnp.pad(x.astype(self.compute_dtype),
                     ((0, Mp - M), (0, self._k0p - K)))

        if self._use_fused:
            mu_p, s2_p = self._fused_forward(xp, tm)
        else:
            mu_p, s2_p = self._layered_forward(xp, tm)

        L = self.latent_features
        return mu_p[:M, :L], s2_p[:M, :L]

    def _fused_forward(self, xp, tm):
        Mp, K0p = xp.shape
        Lp = self._lp
        grid = (Mp // tm,)

        in_specs = [pl.BlockSpec((tm, K0p), lambda i: (i, 0))]
        args = [xp]
        for wp, bp in self._padded_params:
            kp, npad = wp.shape
            in_specs.append(pl.BlockSpec((kp, npad), lambda i: (0, 0)))
            in_specs.append(pl.BlockSpec((1, npad), lambda i: (0, 0)))
            args.append(wp)
            args.append(bp)

        out_shape = (jax.ShapeDtypeStruct((Mp, Lp), jnp.float32),
                     jax.ShapeDtypeStruct((Mp, Lp), jnp.float32))
        out_specs = (pl.BlockSpec((tm, Lp), lambda i: (i, 0)),
                     pl.BlockSpec((tm, Lp), lambda i: (i, 0)))

        kernel = functools.partial(
            _encoder_fused_kernel,
            n_hidden=len(self.hidden_features),
            hidden_act=self.nonlinearity,
            compute_dtype=self.compute_dtype,
        )

        mu_p, s2_p = pl.pallas_call(
            kernel,
            out_shape=out_shape,
            grid_spec=pltpu.PrefetchScalarGridSpec(
                num_scalar_prefetch=0,
                grid=grid,
                in_specs=in_specs,
                out_specs=out_specs,
            ),
            compiler_params=pltpu.CompilerParams(
                dimension_semantics=("parallel",),
                vmem_limit_bytes=self._vmem_limit,
            ),
        )(*args)
        return mu_p, s2_p

    def _layered_forward(self, xp, tm):
        """Fallback: one fused Linear kernel per layer, bf16 padded activations
        end-to-end (no f32 round trips, no re-padding between layers)."""
        n_hidden = len(self.hidden_features)
        h = xp
        for wp, bp in self._padded_params[:n_hidden]:
            h = _fused_linear_padded(h, wp, bp, self.nonlinearity,
                                     out_dtype=self.compute_dtype, tm=tm)
        (w_mu, b_mu), (w_s, b_s) = self._padded_params[n_hidden:]
        mu_p = _fused_linear_padded(h, w_mu, b_mu, "none",
                                    out_dtype=jnp.float32, tm=tm)
        s2_p = _fused_linear_padded(h, w_s, b_s, "softplus",
                                    out_dtype=jnp.float32, tm=tm)
        return mu_p, s2_p


# ----------------------------------------------------------------------------
# Pure-JAX reference at matching precision (bf16 operands, f32 accumulate,
# bf16 activations between layers).
# ----------------------------------------------------------------------------
def _reference_forward(enc: Encoder, x):
    if x.ndim > 2:
        x = x.reshape(-1, x.shape[-1] * x.shape[-2])
    cd = enc.compute_dtype
    act = jnp.tanh if enc.nonlinearity == "tanh" else (lambda v: jnp.maximum(v, 0.0))

    def lin(h_cd, W, b):
        return jnp.dot(h_cd.astype(jnp.float32),
                       W.astype(cd).astype(jnp.float32),
                       preferred_element_type=jnp.float32) + b

    h = x.astype(cd)
    for W, b in enc.ref_hidden:
        h = act(lin(h, W, b)).astype(cd)
    mu = lin(h, enc.ref_mu[0], enc.ref_mu[1])
    s = lin(h, enc.ref_sigma[0], enc.ref_sigma[1])
    sigma_2 = jnp.maximum(s, 0.0) + jnp.log(1.0 + jnp.exp(-jnp.abs(s)))
    return mu, sigma_2


if __name__ == "__main__":
    key = jax.random.PRNGKey(0)
    key, p1, p2, x1k, x2k = jax.random.split(key, 5)

    # --- small encoder: 16x16 images, two hidden layers, tanh -----------------
    enc = Encoder(in_features=16 * 16, hidden_features=(128, 64),
                  latent_features=8, nonlinearity="tanh", key=p1)
    x = jax.random.normal(x1k, (4, 16, 16), jnp.float32)

    mu, sigma_2 = enc(x)
    jax.block_until_ready((mu, sigma_2))

    ref_mu, ref_s2 = _reference_forward(enc, x)
    np.testing.assert_allclose(np.asarray(mu), np.asarray(ref_mu),
                               rtol=2e-2, atol=2e-2)
    np.testing.assert_allclose(np.asarray(sigma_2), np.asarray(ref_s2),
                               rtol=2e-2, atol=2e-2)
    assert mu.shape == (4, 8) and sigma_2.shape == (4, 8)
    assert bool(jnp.all(sigma_2 >= 0.0))

    # Exercise the per-layer fallback path with the same weights/reference.
    enc._use_fused = False
    mu_l, s2_l = enc(x)
    jax.block_until_ready((mu_l, s2_l))
    np.testing.assert_allclose(np.asarray(mu_l), np.asarray(ref_mu),
                               rtol=2e-2, atol=2e-2)
    np.testing.assert_allclose(np.asarray(s2_l), np.asarray(ref_s2),
                               rtol=2e-2, atol=2e-2)
    enc._use_fused = True

    # --- IWAE-default-ish encoder: 28x28 inputs (K=784, pads to 896), hidden
    #     500, relu; batch 288 spans >1 grid block (tm=256 -> grid=(2,)). ------
    enc2 = Encoder(in_features=28 * 28, hidden_features=500,
                   latent_features=2, nonlinearity="relu", key=p2)
    x2 = jax.random.normal(x2k, (288, 28, 28), jnp.float32)

    mu2, s22 = enc2(x2)
    jax.block_until_ready((mu2, s22))

    ref_mu2, ref_s22 = _reference_forward(enc2, x2)
    np.testing.assert_allclose(np.asarray(mu2), np.asarray(ref_mu2),
                               rtol=2e-2, atol=2e-2)
    np.testing.assert_allclose(np.asarray(s22), np.asarray(ref_s22),
                               rtol=2e-2, atol=2e-2)
    assert mu2.shape == (288, 2) and s22.shape == (288, 2)
    assert bool(jnp.all(s22 >= 0.0))

    print("KERNEL_OK")
</pallas_src>

<mosaic_0001>
module attributes {stable_mosaic.version = 11 : i64} {
  func.func @_encoder_fused_kernel(%arg0: i32, %arg1: memref<16x256xbf16, #tpu.memory_space<vmem>>, %arg2: memref<256x128xbf16, #tpu.memory_space<vmem>>, %arg3: memref<1x128xf32, #tpu.memory_space<vmem>>, %arg4: memref<128x128xbf16, #tpu.memory_space<vmem>>, %arg5: memref<1x128xf32, #tpu.memory_space<vmem>>, %arg6: memref<128x128xbf16, #tpu.memory_space<vmem>>, %arg7: memref<1x128xf32, #tpu.memory_space<vmem>>, %arg8: memref<128x128xbf16, #tpu.memory_space<vmem>>, %arg9: memref<1x128xf32, #tpu.memory_space<vmem>>, %arg10: memref<16x128xf32, #tpu.memory_space<vmem>>, %arg11: memref<16x128xf32, #tpu.memory_space<vmem>>) attributes {dimension_semantics = [#tpu.dimension_semantics<parallel>], iteration_bounds = array<i64: 1>, scalar_prefetch = 0 : i64, scratch_operands = 0 : i64, tpu.core_type = #tpu.core_type<tc>, window_params = [{transform_indices = @transform_0, window_bounds = array<i64: 16, 256>}, {pipeline_mode = #tpu.pipeline_mode<synchronous>, transform_indices = @transform_1, window_bounds = array<i64: 256, 128>}, {pipeline_mode = #tpu.pipeline_mode<synchronous>, transform_indices = @transform_2, window_bounds = array<i64: 1, 128>}, {pipeline_mode = #tpu.pipeline_mode<synchronous>, transform_indices = @transform_3, window_bounds = array<i64: 128, 128>}, {pipeline_mode = #tpu.pipeline_mode<synchronous>, transform_indices = @transform_4, window_bounds = array<i64: 1, 128>}, {pipeline_mode = #tpu.pipeline_mode<synchronous>, transform_indices = @transform_5, window_bounds = array<i64: 128, 128>}, {pipeline_mode = #tpu.pipeline_mode<synchronous>, transform_indices = @transform_6, window_bounds = array<i64: 1, 128>}, {pipeline_mode = #tpu.pipeline_mode<synchronous>, transform_indices = @transform_7, window_bounds = array<i64: 128, 128>}, {pipeline_mode = #tpu.pipeline_mode<synchronous>, transform_indices = @transform_8, window_bounds = array<i64: 1, 128>}, {transform_indices = @transform_9, window_bounds = array<i64: 16, 128>}, {transform_indices = @transform_10, window_bounds = array<i64: 16, 128>}]} {
    %c0 = arith.constant 0 : index
    %c0_0 = arith.constant 0 : index
    %0 = vector.load %arg1[%c0, %c0_0] : memref<16x256xbf16, #tpu.memory_space<vmem>>, vector<16x256xbf16>
    %c0_1 = arith.constant 0 : index
    %c0_2 = arith.constant 0 : index
    %1 = vector.load %arg2[%c0_1, %c0_2] : memref<256x128xbf16, #tpu.memory_space<vmem>>, vector<256x128xbf16>
    %cst = arith.constant dense<0.000000e+00> : vector<16x128xf32>
    %2 = tpu.matmul %0, %1, %cst {dimension_numbers = #tpu.dot_dimension_numbers<[1], [0], [0], [1], [0, 0, 1, 1], [], []>} : vector<16x256xbf16>, vector<256x128xbf16>, vector<16x128xf32> -> vector<16x128xf32>
    %c0_3 = arith.constant 0 : index
    %c0_4 = arith.constant 0 : index
    %3 = vector.load %arg3[%c0_3, %c0_4] : memref<1x128xf32, #tpu.memory_space<vmem>>, vector<1x128xf32>
    %4 = vector.broadcast %3 : vector<1x128xf32> to vector<16x128xf32>
    %5 = arith.addf %2, %4 : vector<16x128xf32>
    %6 = math.tanh %5 : vector<16x128xf32>
    %7 = arith.truncf %6 : vector<16x128xf32> to vector<16x128xbf16>
    %c0_5 = arith.constant 0 : index
    %c0_6 = arith.constant 0 : index
    %8 = vector.load %arg4[%c0_5, %c0_6] : memref<128x128xbf16, #tpu.memory_space<vmem>>, vector<128x128xbf16>
    %cst_7 = arith.constant dense<0.000000e+00> : vector<16x128xf32>
    %9 = tpu.matmul %7, %8, %cst_7 {dimension_numbers = #tpu.dot_dimension_numbers<[1], [0], [0], [1], [0, 0, 1, 1], [], []>} : vector<16x128xbf16>, vector<128x128xbf16>, vector<16x128xf32> -> vector<16x128xf32>
    %c0_8 = arith.constant 0 : index
    %c0_9 = arith.constant 0 : index
    %10 = vector.load %arg5[%c0_8, %c0_9] : memref<1x128xf32, #tpu.memory_space<vmem>>, vector<1x128xf32>
    %11 = vector.broadcast %10 : vector<1x128xf32> to vector<16x128xf32>
    %12 = arith.addf %9, %11 : vector<16x128xf32>
    %13 = math.tanh %12 : vector<16x128xf32>
    %14 = arith.truncf %13 : vector<16x128xf32> to vector<16x128xbf16>
    %c0_10 = arith.constant 0 : index
    %c0_11 = arith.constant 0 : index
    %15 = vector.load %arg6[%c0_10, %c0_11] : memref<128x128xbf16, #tpu.memory_space<vmem>>, vector<128x128xbf16>
    %cst_12 = arith.constant dense<0.000000e+00> : vector<16x128xf32>
    %16 = tpu.matmul %14, %15, %cst_12 {dimension_numbers = #tpu.dot_dimension_numbers<[1], [0], [0], [1], [0, 0, 1, 1], [], []>} : vector<16x128xbf16>, vector<128x128xbf16>, vector<16x128xf32> -> vector<16x128xf32>
    %c0_13 = arith.constant 0 : index
    %c0_14 = arith.constant 0 : index
    %17 = vector.load %arg7[%c0_13, %c0_14] : memref<1x128xf32, #tpu.memory_space<vmem>>, vector<1x128xf32>
    %18 = vector.broadcast %17 : vector<1x128xf32> to vector<16x128xf32>
    %19 = arith.addf %16, %18 : vector<16x128xf32>
    %c0_15 = arith.constant 0 : index
    %c0_16 = arith.constant 0 : index
    %20 = vector.load %arg8[%c0_15, %c0_16] : memref<128x128xbf16, #tpu.memory_space<vmem>>, vector<128x128xbf16>
    %cst_17 = arith.constant dense<0.000000e+00> : vector<16x128xf32>
    %21 = tpu.matmul %14, %20, %cst_17 {dimension_numbers = #tpu.dot_dimension_numbers<[1], [0], [0], [1], [0, 0, 1, 1], [], []>} : vector<16x128xbf16>, vector<128x128xbf16>, vector<16x128xf32> -> vector<16x128xf32>
    %c0_18 = arith.constant 0 : index
    %c0_19 = arith.constant 0 : index
    %22 = vector.load %arg9[%c0_18, %c0_19] : memref<1x128xf32, #tpu.memory_space<vmem>>, vector<1x128xf32>
    %23 = vector.broadcast %22 : vector<1x128xf32> to vector<16x128xf32>
    %24 = arith.addf %21, %23 : vector<16x128xf32>
    %c0_20 = arith.constant 0 : index
    %c0_21 = arith.constant 0 : index
    %25 = vector.load %arg10[%c0_20, %c0_21] : memref<16x128xf32, #tpu.memory_space<vmem>>, vector<16x128xf32>
    tpu.vector_store %arg10[%c0_20, %c0_21], %19 {strides = array<i32>} : memref<16x128xf32, #tpu.memory_space<vmem>>, vector<16x128xf32>,
    %cst_22 = arith.constant 0.000000e+00 : f32
    %26 = vector.broadcast %cst_22 : f32 to vector<16x128xf32>
    %27 = arith.maximumf %24, %26 : vector<16x128xf32>
    %28 = math.absf %24 : vector<16x128xf32>
    %cst_23 = arith.constant 0.000000e+00 : f32
    %29 = vector.broadcast %cst_23 : f32 to vector<16x128xf32>
    %30 = arith.subf %29, %28 : vector<16x128xf32>
    %31 = math.exp %30 : vector<16x128xf32>
    %cst_24 = arith.constant 1.000000e+00 : f32
    %32 = vector.broadcast %cst_24 : f32 to vector<16x128xf32>
    %33 = arith.addf %32, %31 : vector<16x128xf32>
    %34 = math.log %33 : vector<16x128xf32>
    %35 = arith.addf %27, %34 : vector<16x128xf32>
    %c0_25 = arith.constant 0 : index
    %c0_26 = arith.constant 0 : index
    %36 = vector.load %arg11[%c0_25, %c0_26] : memref<16x128xf32, #tpu.memory_space<vmem>>, vector<16x128xf32>
    tpu.vector_store %arg11[%c0_25, %c0_26], %35 {strides = array<i32>} : memref<16x128xf32, #tpu.memory_space<vmem>>, vector<16x128xf32>,
    return
  }
  func.func @transform_0(%arg0: i32) -> (i32, i32) {
    %c0_i32 = arith.constant 0 : i32
    %c0_i32_0 = arith.constant 0 : i32
    return %arg0, %c0_i32 : i32, i32
  }
  func.func @transform_1(%arg0: i32) -> (i32, i32) {
    %c0_i32 = arith.constant 0 : i32
    %c0_i32_0 = arith.constant 0 : i32
    %c0_i32_1 = arith.constant 0 : i32
    return %c0_i32, %c0_i32_0 : i32, i32
  }
  func.func @transform_2(%arg0: i32) -> (i32, i32) {
    %c0_i32 = arith.constant 0 : i32
    %c0_i32_0 = arith.constant 0 : i32
    %c0_i32_1 = arith.constant 0 : i32
    return %c0_i32, %c0_i32_0 : i32, i32
  }
  func.func @transform_3(%arg0: i32) -> (i32, i32) {
    %c0_i32 = arith.constant 0 : i32
    %c0_i32_0 = arith.constant 0 : i32
    %c0_i32_1 = arith.constant 0 : i32
    return %c0_i32, %c0_i32_0 : i32, i32
  }
  func.func @transform_4(%arg0: i32) -> (i32, i32) {
    %c0_i32 = arith.constant 0 : i32
    %c0_i32_0 = arith.constant 0 : i32
    %c0_i32_1 = arith.constant 0 : i32
    return %c0_i32, %c0_i32_0 : i32, i32
  }
  func.func @transform_5(%arg0: i32) -> (i32, i32) {
    %c0_i32 = arith.constant 0 : i32
    %c0_i32_0 = arith.constant 0 : i32
    %c0_i32_1 = arith.constant 0 : i32
    return %c0_i32, %c0_i32_0 : i32, i32
  }
  func.func @transform_6(%arg0: i32) -> (i32, i32) {
    %c0_i32 = arith.constant 0 : i32
    %c0_i32_0 = arith.constant 0 : i32
    %c0_i32_1 = arith.constant 0 : i32
    return %c0_i32, %c0_i32_0 : i32, i32
  }
  func.func @transform_7(%arg0: i32) -> (i32, i32) {
    %c0_i32 = arith.constant 0 : i32
    %c0_i32_0 = arith.constant 0 : i32
    %c0_i32_1 = arith.constant 0 : i32
    return %c0_i32, %c0_i32_0 : i32, i32
  }
  func.func @transform_8(%arg0: i32) -> (i32, i32) {
    %c0_i32 = arith.constant 0 : i32
    %c0_i32_0 = arith.constant 0 : i32
    %c0_i32_1 = arith.constant 0 : i32
    return %c0_i32, %c0_i32_0 : i32, i32
  }
  func.func @transform_9(%arg0: i32) -> (i32, i32) {
    %c0_i32 = arith.constant 0 : i32
    %c0_i32_0 = arith.constant 0 : i32
    return %arg0, %c0_i32 : i32, i32
  }
  func.func @transform_10(%arg0: i32) -> (i32, i32) {
    %c0_i32 = arith.constant 0 : i32
    %c0_i32_0 = arith.constant 0 : i32
    return %arg0, %c0_i32 : i32, i32
  }
}

</mosaic_0001>

<bundles_post_ra>
// kernel: tpu_custom_call.1
= control target key start
LH: loop header
LB: loop body
LE: loop exit
PB: predicated region body
PF: predicated region fallthrough
CT: control target
= control target key end

     0   :  { %16 = vsyncpa [#allocation3], 0  ;;  %s1138_s0 = inlined_call_operand.hbm [shape: bf16[16,256], index: 0, kind: input, shape index: {}]   ;;  %s1139_s1 = inlined_call_operand.hbm [shape: bf16[256,128], index: 1, kind: input, shape index: {}]   ;;  %s1140_s2 = inlined_call_operand.vmem [shape: f32[1,128], index: 2, kind: input, shape index: {}]   ;;  %s1141_s3 = inlined_call_operand.hbm [shape: bf16[128,128], index: 3, kind: input, shape index: {}]   ;;  %s1142_s4 = inlined_call_operand.vmem [shape: f32[1,128], index: 4, kind: input, shape index: {}]   ;;  %s1143_s5 = inlined_call_operand.hbm [shape: bf16[128,128], index: 5, kind: input, shape index: {}]   ;;  %s1144_s6 = inlined_call_operand.vmem [shape: f32[1,128], index: 6, kind: input, shape index: {}]   ;;  %s1145_s7 = inlined_call_operand.hbm [shape: bf16[128,128], index: 7, kind: input, shape index: {}]   ;;  %s1146_s8 = inlined_call_operand.vmem [shape: f32[1,128], index: 8, kind: input, shape index: {}]   ;;  %s1147_s9 = inlined_call_operand.hbm [shape: f32[16,128], index: 9, kind: output, shape index: {0}]   ;;  %s1148_s10 = inlined_call_operand.hbm [shape: f32[16,128], index: 10, kind: output, shape index: {1}]  }
   0x1   :  { %17 = vsyncpa [#allocation6], 0 }
   0x2   :  { %18 = vsyncpa [#allocation9], 0 }
   0x3   :  { %19 = vsyncpa [#allocation4], 0  ;;  %s38_s15 = sshll.u32 %s1139_s1, 4  ;;  %s39_s15 = int_to_ptr.hbm [resolvable:$true] %s38_s15 }
   0x4   :  { %20 = vsyncpa [#allocation13], 0  ;;  %s1018_s16 = smov [#allocation5]   ;;  %s68_s20 = sshll.u32 %s1143_s5, 4  ;;  %s69_s20 = int_to_ptr.hbm [resolvable:$true] %s68_s20 }
   0x5   :  { %s40_s17 = sshll.u32 %s1018_s16, 4  ;;  %s1019_s21 = smov 64   ;;  %s41_s17 = int_to_ptr.vmem [resolvable:$true] %s40_s17 }
   0x6   :  { %s1020_s22 = smov 4   ;;  %s1021_s23 = smov [#allocation8]  }
   0x7   :  { %46 = dma.hbm_to_vmem [thread:$0]  %s39_s15, 2048, %s41_s17, [#allocation6], %s1019_s21, %s1019_s21, %s1020_s22  }
   0x8   :  { %s70_s24 = sshll.u32 %s1021_s23, 4  ;;  %s25_s26 = sshll.u32 %s1138_s0, 4  ;;  %s71_s24 = int_to_ptr.vmem [resolvable:$true] %s70_s24  ;;  %s26_s26 = int_to_ptr.hbm [resolvable:$true] %s25_s26 }
   0x9   :  { %76 = dma.hbm_to_vmem [thread:$0]  %s69_s20, 1024, %s71_s24, [#allocation9], %s1019_s21, %s1019_s21, %s1020_s22  }
   0xa   :  { %s1022_s5 = smov [#allocation2]   ;;  %s53_s30 = sshll.u32 %s1141_s3, 4  ;;  %s54_s30 = int_to_ptr.hbm [resolvable:$true] %s53_s30 }
   0xb   :  { %s27_s27 = sshll.u32 %s1022_s5, 4  ;;  %s1023_s11 = smov 128   ;;  %s28_s27 = int_to_ptr.vmem [resolvable:$true] %s27_s27 }
   0xc   :  { %s1024_s12 = smov 8   ;;  %s1025_s0 = smov [#allocation7]  }
   0xd   :  { %33 = dma.hbm_to_vmem [thread:$0]  %s26_s26, 256, %s28_s27, [#allocation3], %s1023_s11, %s1023_s11, %s1024_s12  }
   0xe   :  { %s55_s13 = sshll.u32 %s1025_s0, 4  ;;  %s83_s16 = sshll.u32 %s1145_s7, 4  ;;  %s56_s13 = int_to_ptr.vmem [resolvable:$true] %s55_s13  ;;  %s84_s16 = int_to_ptr.hbm [resolvable:$true] %s83_s16 }
   0xf   :  { %61 = dma.hbm_to_vmem [thread:$0]  %s54_s30, 1024, %s56_s13, [#allocation6], %s1019_s21, %s1019_s21, %s1020_s22  }
  0x10   :  { %s1026_s3 = smov [#allocation10]  }
  0x11   :  { %s85_s17 = sshll.u32 %s1026_s3, 4  ;;  %s86_s17 = int_to_ptr.vmem [resolvable:$true] %s85_s17 }
  0x12   :  { %91 = dma.hbm_to_vmem [thread:$0]  %s84_s16, 1024, %s86_s17, [#allocation9], %s1019_s21, %s1019_s21, %s1020_s22  }
  0x13   :  { %1008 = dma.done.wait [#allocation3], 256  }
  0x14   :  { %1009 = vsyncadd [#allocation3], 4294967040 }
  0x15   :  { %1010 = dma.done.wait [#allocation6], 3072  }
  0x16   :  { %1011 = vsyncadd [#allocation6], 4294964224 }
  0x17   :  { %1012 = dma.done.wait [#allocation9], 2048  }
  0x18   :  { %1013 = vsyncadd [#allocation9], 4294965248  ;;  %v776_v0 = vld [vmem:[#allocation5 + $0x38] sm:$0xff]  ;;  %v775_v2 = vld [vmem:[#allocation5 + $0x30] sm:$0xff]  ;;  %s566_s1 = sshll.u32 %s1147_s9, 4  ;;  %s579_s27 = sshll.u32 %s1148_s10, 4  ;;  %s567_s1 = int_to_ptr.hbm [resolvable:$true] %s566_s1  ;;  %s580_s27 = int_to_ptr.hbm [resolvable:$true] %s579_s27 }
  0x19   :  { %v784_v1 = vld [vmem:[#allocation5 + $0x78] sm:$0xff]  ;;  %258 = vmatpush.bf16.msra.mxu0 %v776_v0  ;;  %v783_v3 = vld [vmem:[#allocation5 + $0x70] sm:$0xff]  ;;  %v774_v4 = vld [vmem:[#allocation5 + $0x28] sm:$0xff] }
  0x1a   :  { %272 = vmatpush.bf16.msra.mxu1 %v784_v1  ;;  %v782_v5 = vld [vmem:[#allocation5 + $0x68] sm:$0xff]  ;;  %v792_v6 = vld [vmem:[#allocation7 + $0x38] sm:$0xff]  ;;  %v791_v7 = vld [vmem:[#allocation7 + $0x30] sm:$0xff] }
  0x1b   :  { %357 = vmatpush.bf16.msra.mxu2 %v792_v6  ;;  %v773_v8 = vld [vmem:[#allocation5 + $0x20] sm:$0xff]  ;;  %v790_v10 = vld [vmem:[#allocation7 + $0x28] sm:$0xff]  ;;  %v772_v11 = vld [vmem:[#allocation5 + $0x18] sm:$0xff] }
  0x1c   :  { %v781_v9 = vld [vmem:[#allocation5 + $0x60] sm:$0xff]  ;;  %v780_v12 = vld [vmem:[#allocation5 + $0x58] sm:$0xff]  ;;  %v771_v13 = vld [vmem:[#allocation5 + $0x10] sm:$0xff] }
  0x1d   :  { %259 = vmatpush.bf16.msra.mxu0 %v775_v2  ;;  %v779_v14 = vld [vmem:[#allocation5 + $0x50] sm:$0xff]  ;;  %v770_v15 = vld [vmem:[#allocation5 + $0x8] sm:$0xff]  ;;  %v769_v17 = vld [vmem:[#allocation5] sm:$0xff] }
  0x1e   :  { %273 = vmatpush.bf16.msra.mxu1 %v783_v3  ;;  %v778_v16 = vld [vmem:[#allocation5 + $0x48] sm:$0xff]  ;;  %v777_v18 = vld [vmem:[#allocation5 + $0x40] sm:$0xff]  ;;  %v601_v19 = vld [vmem:[#allocation2] sm:$0xf] }
  0x1f   :  { %358 = vmatpush.bf16.msra.mxu2 %v791_v7  ;;  %v768_v20 = vld [vmem:[#allocation2 + $0x4] sm:$0xf0]  ;;  %v767_v21 = vld [vmem:[#allocation2 + $0x4] sm:$0xf]  ;;  %v603_v22 = vld [vmem:[#allocation2 + $0x8] sm:$0xf0] }
  0x20   :  { %v602_v23 = vor.u32 %v768_v20, %v601_v19  ;;  %v606_v24 = vor.u32 %v767_v21, %v603_v22  ;;  %v789_v25 = vld [vmem:[#allocation7 + $0x20] sm:$0xff]  ;;  %v788_v26 = vld [vmem:[#allocation7 + $0x18] sm:$0xff]  ;;  %v787_v27 = vld [vmem:[#allocation7 + $0x10] sm:$0xff] }
  0x21   :  { %260 = vmatpush.bf16.msra.mxu0 %v774_v4  ;;  %v786_v28 = vld [vmem:[#allocation7 + $0x8] sm:$0xff]  ;;  %v785_v29 = vld [vmem:[#allocation7] sm:$0xff]  ;;  %v800_v30 = vld [vmem:[#allocation8 + $0x38] sm:$0xff] }
  0x22   :  { %274 = vmatpush.bf16.msra.mxu1 %v782_v5  ;;  %v808_v31 = vld [vmem:[#allocation10 + $0x38] sm:$0xff]  ;;  %442 = vmatpush.bf16.msra.mxu3 %v800_v30  ;;  %v799_v32 = vld [vmem:[#allocation8 + $0x30] sm:$0xff]  ;;  %v798_v34 = vld [vmem:[#allocation8 + $0x28] sm:$0xff] }
  0x23   :  { %359 = vmatpush.bf16.msra.mxu2 %v790_v10  ;;  %v807_v33 = vld [vmem:[#allocation10 + $0x30] sm:$0xff]  ;;  %v806_v35 = vld [vmem:[#allocation10 + $0x28] sm:$0xff]  ;;  %v797_v48 = vld [vmem:[#allocation8 + $0x20] sm:$0xff] }
  0x24   :  { %v820_v36 = vld [vmem:[%s1140_s2] ss:$0 sm:$0xff]  ;;  %v805_v49 = vld [vmem:[#allocation10 + $0x20] sm:$0xff]  ;;  %v796_v50 = vld [vmem:[#allocation8 + $0x18] sm:$0xff] }
  0x25   :  { %261 = vmatpush.bf16.msra.mxu0 %v773_v8  ;;  %v804_v51 = vld [vmem:[#allocation10 + $0x18] sm:$0xff]  ;;  %v795_v52 = vld [vmem:[#allocation8 + $0x10] sm:$0xff]  ;;  %v794_v54 = vld [vmem:[#allocation8 + $0x8] sm:$0xff] }
  0x26   :  { %275 = vmatpush.bf16.msra.mxu1 %v781_v9  ;;  %443 = vmatpush.bf16.msra.mxu3 %v799_v32  ;;  %v803_v53 = vld [vmem:[#allocation10 + $0x10] sm:$0xff]  ;;  %v802_v55 = vld [vmem:[#allocation10 + $0x8] sm:$0xff]  ;;  %v793_v56 = vld [vmem:[#allocation8] sm:$0xff] }
  0x27   :  { %360 = vmatpush.bf16.msra.mxu2 %v789_v25  ;;  %v801_v57 = vld [vmem:[#allocation10] sm:$0xff]  ;;  %v821_v59 = vld [vmem:[%s1142_s4] ss:$0 sm:$0xff]  ;;  %s1027_s4 = smov [#allocation11]  }
  0x28   :  { %v822_v2 = vld [vmem:[%s1146_s8] ss:$0 sm:$0xff]  ;;  %s564_s24 = sshll.u32 %s1027_s4, 4  ;;  %s565_s24 = int_to_ptr.vmem [resolvable:$true] %s564_s24 }
  0x29   :  { %262 = vmatpush.bf16.msra.mxu0 %v772_v11  ;;  %v823_v6 = vld [vmem:[%s1144_s6] ss:$0 sm:$0xff]  ;;  %s1028_s6 = smov [#allocation12]  }
  0x2a   :  { %276 = vmatpush.bf16.msra.mxu1 %v780_v12  ;;  %444 = vmatpush.bf16.msra.mxu3 %v798_v34  ;;  %s577_s9 = sshll.u32 %s1028_s6, 4  ;;  %s578_s9 = int_to_ptr.vmem [resolvable:$true] %s577_s9 }
  0x2b   :  { %361 = vmatpush.bf16.msra.mxu2 %v788_v26 }
  0x2d   :  { %263 = vmatpush.bf16.msra.mxu0 %v771_v13 }
  0x2e   :  { %277 = vmatpush.bf16.msra.mxu1 %v779_v14  ;;  %445 = vmatpush.bf16.msra.mxu3 %v797_v48 }
  0x2f   :  { %362 = vmatpush.bf16.msra.mxu2 %v787_v27 }
  0x31   :  { %264 = vmatpush.bf16.msra.mxu0 %v770_v15 }
  0x32   :  { %278 = vmatpush.bf16.msra.mxu1 %v778_v16  ;;  %446 = vmatpush.bf16.msra.mxu3 %v796_v50 }
  0x33   :  { %363 = vmatpush.bf16.msra.mxu2 %v786_v28 }
  0x35   :  { %265 = vmatpush.bf16.msra.mxu0 %v769_v17 }
  0x36   :  { %279 = vmatpush.bf16.msra.mxu1 %v777_v18  ;;  %447 = vmatpush.bf16.msra.mxu3 %v795_v52 }
  0x37   :  { %364 = vmatpush.bf16.msra.mxu2 %v785_v29 }
  0x38   :  { %266 = vmatmul.bf16.vlgmr.msra.gmra.mxu0 %v602_v23 }
  0x39   :  { %280 = vmatmul.bf16.vlgmr.msra.gmra.mxu1 %v606_v24  ;;  %524 = vmatpush.bf16.msrb.mxu0 %v808_v31 }
  0x3a   :  { %448 = vmatpush.bf16.msra.mxu3 %v794_v54 }
  0x3d   :  { %525 = vmatpush.bf16.msrb.mxu0 %v807_v33 }
  0x3e   :  { %449 = vmatpush.bf16.msra.mxu3 %v793_v56 }
  0x41   :  { %526 = vmatpush.bf16.msrb.mxu0 %v806_v35 }
  0x45   :  { %527 = vmatpush.bf16.msrb.mxu0 %v805_v49 }
  0x49   :  { %528 = vmatpush.bf16.msrb.mxu0 %v804_v51 }
  0x4d   :  { %529 = vmatpush.bf16.msrb.mxu0 %v803_v53 }
  0x51   :  { %530 = vmatpush.bf16.msrb.mxu0 %v802_v55 }
  0x55   :  { %531 = vmatpush.bf16.msrb.mxu0 %v801_v57 }
  0xb5   :  { %v267_v37 = vpop.f32.mrf.mxu0 }
  0xb6   :  { %v281_v38 = vpop.f32.mrf.mxu1  ;;  %v268_v39 = vadd.f32 %v820_v36, %v267_v37 }
  0xb8   :  { %v282_v40 = vadd.f32 %v281_v38, %v268_v39 }
  0xba   :  { %824 = vtanh.f32 %v282_v40 }
  0xbd   :  { %v269_v41 = vpop.f32.mrf.mxu0 }
  0xbe   :  { %v270_v42 = vadd.f32 %v820_v36, %v269_v41  ;;  %v283_v43 = vpop.f32.mrf.mxu1 }
  0xc0   :  { %v284_v44 = vadd.f32 %v283_v43, %v270_v42  ;;  %v825_v45 = vpop.eup %824 }
  0xc2   :  { %826 = vtanh.f32 %v284_v44 }
  0xc8   :  { %v827_v46 = vpop.eup %826 }
  0xc9   :  { %v288_v47 = vpack.c.bf16 %v827_v46, %v825_v45 }
  0xcb   :  { %365 = vmatmul.bf16.vlgmr.msra.gmra.mxu2 %v288_v47 }
 0x14e   :  { %v366_v58 = vpop.f32.mrf.mxu2 }
 0x14f   :  { %v367_v60 = vadd.f32 %v821_v59, %v366_v58 }
 0x151   :  { %828 = vtanh.f32 %v367_v60 }
 0x156   :  { %v368_v61 = vpop.f32.mrf.mxu2 }
 0x157   :  { %v369_v62 = vadd.f32 %v821_v59, %v368_v61  ;;  %v829_v63 = vpop.eup %828 }
 0x159   :  { %830 = vtanh.f32 %v369_v62 }
 0x15f   :  { %v831_v0 = vpop.eup %830 }
 0x160   :  { %v373_v1 = vpack.c.bf16 %v831_v0, %v829_v63 }
 0x162   :  { %450 = vmatmul.bf16.vlgmr.msra.gmra.mxu3 %v373_v1  ;;  %532 = vmatmul.bf16.vlgmr.msrb.gmra.mxu0 %v373_v1 }
 0x1df   :  { %v533_v3 = vpop.f32.mrf.mxu0 }
 0x1e0   :  { %v534_v4 = vadd.f32 %v822_v2, %v533_v3 }
 0x1e2   :  { %v542_v5 = vand.u32 2147483647, %v534_v4  ;;  %v540_v23 = vmax.f32 %v534_v4, 0.0 }
 0x1e4   :  { %v544_v7 = vsub.f32 0.0, %v542_v5 }
 0x1e5   :  { %v451_v8 = vpop.f32.mrf.mxu3 }
 0x1e6   :  { %v546_v9 = vmul.f32 1.442695, %v544_v7  ;;  %v452_v10 = vadd.f32 %v823_v6, %v451_v8 }
 0x1e7   :  { %v535_v11 = vpop.f32.mrf.mxu0 }
 0x1e8   :  { %832 = vpow2.f32 %v546_v9  ;;  %538 = vst [vmem:[#allocation11] sm:$0xff] %v452_v10  ;;  %v536_v12 = vadd.f32 %v822_v2, %v535_v11 }
 0x1ea   :  { %v543_v13 = vand.u32 2147483647, %v536_v12  ;;  %v541_v27 = vmax.f32 %v536_v12, 0.0 }
 0x1ec   :  { %v545_v14 = vsub.f32 0.0, %v543_v13 }
 0x1ed   :  { %v453_v15 = vpop.f32.mrf.mxu3 }
 0x1ee   :  { %v833_v16 = vpop.eup %832  ;;  %v548_v17 = vmul.f32 1.442695, %v545_v14  ;;  %v454_v18 = vadd.f32 %v823_v6, %v453_v15 }
 0x1ef   :  { %v550_v19 = vadd.f32 1.0, %v833_v16 }
 0x1f0   :  { %834 = vpow2.f32 %v548_v17  ;;  %539 = vst [vmem:[#allocation11 + $0x8] sm:$0xff] %v454_v18 }
 0x1f1   :  { %836 = vlog2.f32 %v550_v19  ;;  %572 = dma.vmem_to_hbm [thread:$0]  %s565_s24, 256, %s567_s1, [#allocation4], %s1023_s11, %s1023_s11, %s1024_s12  }
 0x1f6   :  { %v835_v20 = vpop.eup %834 }
 0x1f7   :  { %v837_v21 = vpop.eup %836  ;;  %v551_v22 = vadd.f32 1.0, %v835_v20 }
 0x1f8   :  { %v553_v24 = vmul.f32 0.6931472, %v837_v21 }
 0x1f9   :  { %838 = vlog2.f32 %v551_v22 }
 0x1fa   :  { %v556_v25 = vadd.f32 %v553_v24, %v540_v23 }
 0x1fc   :  { %558 = vst [vmem:[#allocation12] sm:$0xff] %v556_v25 }
 0x1ff   :  { %v839_v26 = vpop.eup %838 }
 0x200   :  { %v555_v28 = vmul.f32 0.6931472, %v839_v26 }
 0x202   :  { %v557_v29 = vadd.f32 %v555_v28, %v541_v27 }
 0x204   :  { %559 = vst [vmem:[#allocation12 + $0x8] sm:$0xff] %v557_v29 }
 0x205   :  { %585 = dma.vmem_to_hbm [thread:$0]  %s578_s9, 256, %s580_s27, [#allocation13], %s1023_s11, %s1023_s11, %s1024_s12  }
 0x206   :  { %1014 = dma.done.wait [#allocation4], 256  }
 0x207   :  { %1015 = vsyncadd [#allocation4], 4294967040 }
 0x208   :  { %1016 = dma.done.wait [#allocation13], 256  }
 0x209   :  { %1017 = vsyncadd [#allocation13], 4294967040 }
 0x20a   :  { %594 = vsyncpa [#allocation3], 1 }
 0x20b   :  { %595 = vsyncpa [#allocation6], 1 }
 0x20c   :  { %596 = vsyncpa [#allocation9], 1 }
 0x20d   :  { %597 = vsyncpa [#allocation4], 1 }
 0x20e   :  { %598 = vsyncpa [#allocation13], 1 }

</bundles_post_ra>
